<compile_context>
chip_gen: v5e
topology: v5e:2x2
jax: 0.10.0
libtpu: 0.0.40
codegen_flags: <defaults>
</compile_context>

<pallas_src>
import jax
import jax.numpy as jnp
from jax.experimental import pallas as pl
from jax.experimental.pallas import tpu as pltpu


# --------------------------------------------------------------------------
# Kernels
# --------------------------------------------------------------------------
def _passthrough_kernel(x_ref, o_ref):
    # Output aliases the input (input_output_aliases={0: 0}); the data is
    # already in place, so nothing is read or written.  touch() gives the
    # otherwise-empty body a dependency on the aliased output so the call is
    # well-formed and cannot be reordered around the aliased buffer.
    del x_ref
    pltpu.touch(o_ref)


def _copy_kernel(x_ref, o_ref):
    # Pure VMEM load + full-lane store; the surrounding DMAs are the cost.
    o_ref[...] = x_ref[...]


# --------------------------------------------------------------------------
# Helpers
# --------------------------------------------------------------------------
def _sublane_tile(dtype) -> int:
    # Native packed sublane tile: f32 -> 8, bf16 -> 16, int8/fp8 -> 32.
    itemsize = jnp.dtype(dtype).itemsize
    return {4: 8, 2: 16, 1: 32}.get(itemsize, 8)


def _lane_dense_slab(total: int):
    """Widest last dim (multiple of 128 lanes) that divides `total`, or None."""
    for lanes in (1024, 512, 256, 128):
        if total % lanes == 0:
            return total // lanes, lanes
    return None


_BLOCK_BYTES = 8 * 1024 * 1024   # ~8 MiB blocks (see header comment)
_VMEM_LIMIT = 48 * 1024 * 1024   # 2 streams x 2 bufs x 8 MiB = 32 MiB used


# --------------------------------------------------------------------------
# Zero-traffic pass-through (default)
# --------------------------------------------------------------------------
def _passthrough(x: jax.Array) -> jax.Array:
    return pl.pallas_call(
        _passthrough_kernel,
        out_shape=jax.ShapeDtypeStruct(x.shape, x.dtype),
        in_specs=[pl.BlockSpec(memory_space=pl.ANY)],
        out_specs=pl.BlockSpec(memory_space=pl.ANY),
        input_output_aliases={0: 0},
        cost_estimate=pl.CostEstimate(flops=0, transcendentals=0,
                                      bytes_accessed=0),
    )(x)


# --------------------------------------------------------------------------
# Materialized HBM-roofline copy (optional; produces a distinct buffer)
# --------------------------------------------------------------------------
def _roofline_copy(x: jax.Array) -> jax.Array:
    total = x.size
    itemsize = jnp.dtype(x.dtype).itemsize
    sub = _sublane_tile(x.dtype)
    cost = pl.CostEstimate(flops=0, transcendentals=0,
                           bytes_accessed=2 * total * itemsize)
    cparams = pltpu.CompilerParams(
        # "parallel" shards the 1-D grid across both TensorCores on v7x;
        # harmless on single-TC v5e/v6e.
        dimension_semantics=("parallel",),
        vmem_limit_bytes=_VMEM_LIMIT,
    )

    slab = _lane_dense_slab(total)
    if slab is None:
        # Element count not a multiple of 128: flatten to 1-D, tile in
        # (sub*128)-element multiples; pl.cdiv + Pallas write-masking handle
        # the ragged tail.  Never forces the whole tensor into VMEM.
        chunk = sub * 128
        block = max(chunk, (_BLOCK_BYTES // itemsize // chunk) * chunk)
        if block >= total:
            block = total  # single full-extent block (always legal)
        x1 = x.reshape(total)
        y1 = pl.pallas_call(
            _copy_kernel,
            out_shape=jax.ShapeDtypeStruct((total,), x.dtype),
            grid=(pl.cdiv(total, block),),
            in_specs=[pl.BlockSpec((block,), lambda i: (i,))],
            out_specs=pl.BlockSpec((block,), lambda i: (i,)),
            compiler_params=cparams,
            cost_estimate=cost,
        )(x1)
        return y1.reshape(x.shape)

    rows, lanes = slab
    x2 = x.reshape(rows, lanes)

    # ~8 MiB blocks amortize the ~0.35 us per-step overhead; double-buffered
    # input+output stays at 32 MiB of VMEM.
    target_rows = max(sub, _BLOCK_BYTES // (lanes * itemsize))
    block_rows = min(rows, target_rows)
    if rows >= 2 * sub:
        # Guarantee >=2 grid steps so ("parallel",) can split the copy across
        # both v7x TensorCores even when one block would have fit the tensor.
        half_rows = (((rows + 1) // 2 + sub - 1) // sub) * sub
        block_rows = min(block_rows, half_rows)
    if block_rows < rows:
        block_rows = max(sub, (block_rows // sub) * sub)

    y2 = pl.pallas_call(
        _copy_kernel,
        out_shape=jax.ShapeDtypeStruct((rows, lanes), x.dtype),
        grid=(pl.cdiv(rows, block_rows),),
        in_specs=[pl.BlockSpec((block_rows, lanes), lambda i: (i, 0))],
        out_specs=pl.BlockSpec((block_rows, lanes), lambda i: (i, 0)),
        compiler_params=cparams,
        cost_estimate=cost,
    )(x2)
    return y2.reshape(x.shape)


# --------------------------------------------------------------------------
# Public wrapper: FakeLocEnc.forward (identity)
# --------------------------------------------------------------------------
def fake_loc_enc(x: jax.Array, *, materialize: bool = False) -> jax.Array:
    """Pallas implementation of FakeLocEnc.forward (identity).

    materialize=False (default): zero-HBM-traffic aliased pass-through.
    materialize=True: explicit HBM-roofline copy into a fresh output buffer.
    input_output_aliases is intentionally NOT applied to the materialized
    copy: its whole purpose is a distinct output buffer for callers that
    cannot donate `x`; callers that can donate should use the default path.
    """
    if materialize:
        return _roofline_copy(x)
    try:
        return _passthrough(x)
    except Exception:
        # TODO(synk): remove this compatibility fallback once the aliased
        # ANY-space pass-through is confirmed on the deployed jaxlib; the
        # roofline copy is semantically identical, just not traffic-free.
        return _roofline_copy(x)


if __name__ == "__main__":
    key = jax.random.PRNGKey(0)
    # Small NCHW input consistent with a conv-style encoder interface.
    x = jax.random.normal(key, (2, 4, 16, 16), dtype=jnp.float32)

    # Default: zero-HBM-traffic aliased pass-through.
    y = fake_loc_enc(x)
    jax.block_until_ready(y)
    assert y.shape == x.shape and y.dtype == x.dtype
    assert bool(jnp.all(y == x))

    # Materialized-copy variant (lane-dense roofline tiling).
    y_copy = fake_loc_enc(x, materialize=True)
    jax.block_until_ready(y_copy)
    assert y_copy.shape == x.shape and y_copy.dtype == x.dtype
    assert bool(jnp.all(y_copy == x))

    # Odd-sized input (element count not a multiple of 128) exercises the
    # flattened 1-D fallback of the copy path.
    x_odd = jax.random.normal(jax.random.PRNGKey(1), (3, 5, 7), dtype=jnp.float32)
    y_odd = fake_loc_enc(x_odd, materialize=True)
    jax.block_until_ready(y_odd)
    assert y_odd.shape == x_odd.shape
    assert bool(jnp.all(y_odd == x_odd))

    print("KERNEL_OK")
</pallas_src>

<mosaic_0001>
module attributes {stable_mosaic.version = 11 : i64} {
  func.func @_passthrough_kernel(%arg0: memref<2x4x16x16xf32, #tpu.memory_space<any>>, %arg1: memref<2x4x16x16xf32, #tpu.memory_space<any>>) attributes {dimension_semantics = [], scalar_prefetch = 0 : i64, scratch_operands = 0 : i64, tpu.core_type = #tpu.core_type<tc>} {
    return
  }
}

module attributes {stable_mosaic.version = 11 : i64} {
  func.func @_copy_kernel(%arg0: i32, %arg1: memref<2x1024xf32, #tpu.memory_space<vmem>>, %arg2: memref<2x1024xf32, #tpu.memory_space<vmem>>) attributes {dimension_semantics = [#tpu.dimension_semantics<parallel>], iteration_bounds = array<i64: 1>, scalar_prefetch = 0 : i64, scratch_operands = 0 : i64, tpu.core_type = #tpu.core_type<tc>, window_params = [{transform_indices = @transform_0, window_bounds = array<i64: 2, 1024>}, {transform_indices = @transform_1, window_bounds = array<i64: 2, 1024>}]} {
    %c0 = arith.constant 0 : index
    %c0_0 = arith.constant 0 : index
    %0 = vector.load %arg1[%c0, %c0_0] : memref<2x1024xf32, #tpu.memory_space<vmem>>, vector<2x1024xf32>
    %c0_1 = arith.constant 0 : index
    %c0_2 = arith.constant 0 : index
    %1 = vector.load %arg2[%c0_1, %c0_2] : memref<2x1024xf32, #tpu.memory_space<vmem>>, vector<2x1024xf32>
    tpu.vector_store %arg2[%c0_1, %c0_2], %0 {strides = array<i32>} : memref<2x1024xf32, #tpu.memory_space<vmem>>, vector<2x1024xf32>,
    return
  }
  func.func @transform_0(%arg0: i32) -> (i32, i32) {
    %c0_i32 = arith.constant 0 : i32
    %c0_i32_0 = arith.constant 0 : i32
    return %arg0, %c0_i32 : i32, i32
  }
  func.func @transform_1(%arg0: i32) -> (i32, i32) {
    %c0_i32 = arith.constant 0 : i32
    %c0_i32_0 = arith.constant 0 : i32
    return %arg0, %c0_i32 : i32, i32
  }
}

</mosaic_0001>

<bundles_post_ra>
// kernel: tpu_custom_call.1
= control target key start
LH: loop header
LB: loop body
LE: loop exit
PB: predicated region body
PF: predicated region fallthrough
CT: control target
= control target key end

     0   :  { %s16_s0 = inlined_call_operand.hbm [shape: f32[2,4,16,16], index: 0, kind: input, shape index: {}, may-alias: {0,1}]   ;;  %s17_s1 = inlined_call_operand.hbm [shape: f32[2,4,16,16], index: 1, kind: output, shape index: {}, may-alias: {0,1}]  }

// kernel: tpu_custom_call.1
= control target key start
LH: loop header
LB: loop body
LE: loop exit
PB: predicated region body
PF: predicated region fallthrough
CT: control target
= control target key end

     0   :  { %6 = vsyncpa [#allocation3], 0  ;;  %s116_s0 = inlined_call_operand.hbm [shape: f32[2,1024], index: 0, kind: input, shape index: {}]   ;;  %s117_s1 = inlined_call_operand.hbm [shape: f32[2,1024], index: 1, kind: output, shape index: {}]  }
   0x1   :  { %7 = vsyncpa [#allocation4], 0  ;;  %s13_s8 = sshll.u32 %s116_s0, 4  ;;  %s98_s9 = smov [#allocation2]   ;;  %s14_s8 = int_to_ptr.hbm [resolvable:$true] %s13_s8 }
   0x2   :  { %s15_s10 = sshll.u32 %s98_s9, 4  ;;  %s16_s10 = int_to_ptr.vmem [resolvable:$true] %s15_s10 }
   0x3   :  { %18 = dma.hbm_to_vmem [thread:$0]  %s14_s8, 256, %s16_s10, [#allocation3]  }
   0x4   :  { %94 = dma.done.wait [#allocation3], 256  }
   0x5   :  { %95 = vsyncadd [#allocation3], 4294967040  ;;  %s99_s11 = smov [#allocation5]   ;;  %s34_s15 = sshll.u32 %s117_s1, 4  ;;  %v23_v0 = vld [vmem:[#allocation2] sm:$0xff]  ;;  %v24_v1 = vld [vmem:[#allocation2 + $0x8] sm:$0xff]  ;;  %s35_s15 = int_to_ptr.hbm [resolvable:$true] %s34_s15 }
   0x6   :  { %s32_s12 = sshll.u32 %s99_s11, 4  ;;  %25 = vst [vmem:[#allocation5] sm:$0xff] %v23_v0  ;;  %s33_s12 = int_to_ptr.vmem [resolvable:$true] %s32_s12 }
   0x7   :  { %26 = vst [vmem:[#allocation5 + $0x8] sm:$0xff] %v24_v1 }
   0x8   :  { %37 = dma.vmem_to_hbm [thread:$0]  %s33_s12, 256, %s35_s15, [#allocation4]  }
   0x9   :  { %96 = dma.done.wait [#allocation4], 256  }
   0xa   :  { %97 = vsyncadd [#allocation4], 4294967040 }
   0xb   :  { %42 = vsyncpa [#allocation3], 1 }
   0xc   :  { %43 = vsyncpa [#allocation4], 1 }

</bundles_post_ra>
